<compile_context>
chip_gen: v6e
topology: v6e:2x2x1
jax: 0.10.0
libtpu: 0.0.40
codegen_flags: <defaults>
</compile_context>

<pallas_src>
import functools

import jax
import jax.numpy as jnp
from jax import lax
from jax.experimental import pallas as pl
from jax.experimental.pallas import tpu as pltpu


def _cdiv(a: int, b: int) -> int:
    return -(-a // b)


# ---------- Path A: the whole reduction axis fits one VMEM tile (1-D grid over rows) ----------
def _mean_rows_kernel(x_ref, o_ref, *, inv_s: float):
    # x_ref: (tm, S) native dtype; o_ref: (tm, 1) f32
    s = jnp.sum(x_ref[...].astype(jnp.float32), axis=-1, keepdims=True)
    o_ref[...] = s * inv_s


# ---------- Path B: reduction axis tiled (optionally split across 2 cores on v7x) ----------
def _mean_acc_kernel(x_ref, o_ref, acc_ref, *, inv_s: float, ts: int, s_total: int,
                     n_per_split: int, need_mask: bool):
    j = pl.program_id(2)

    @pl.when(j == 0)
    def _init():
        acc_ref[...] = jnp.zeros_like(acc_ref)

    xv = x_ref[...].astype(jnp.float32)
    if need_mask:
        # Global reduction step for this (split, step); mask lanes beyond the true S extent
        # (covers both the ragged tail block and the clamped duplicate block of an odd split).
        g = pl.program_id(0) * n_per_split + j
        valid = s_total - g * ts
        lane = lax.broadcasted_iota(jnp.int32, xv.shape, 1)
        xv = jnp.where(lane < valid, xv, 0.0)

    acc_ref[...] += jnp.sum(xv, axis=-1, keepdims=True)

    @pl.when(j == pl.num_programs(2) - 1)
    def _finalize():
        o_ref[...] = acc_ref[...] * inv_s


def global_mean_pool_3d(x, *, tile_budget_bytes: int = 8 * 1024 * 1024, row_cap: int = 256):
    """mean over the last three dims: (..., D, H, W) -> (...).  Matches th.mean(x, dim=(-3,-2,-1))."""
    assert x.ndim >= 3, "need at least 3 dims to pool over (-3, -2, -1)"
    lead = x.shape[:-3]
    D, H, W = x.shape[-3:]
    S = D * H * W
    M = 1
    for d in lead:
        M *= int(d)

    # Free, contiguous flatten; native dtype (no pad, no upcast pass).
    x2 = x.reshape(M, S)
    itemsize = jnp.dtype(x.dtype).itemsize
    inv_s = 1.0 / S

    # Row tile: full extent when it fits (exempt from the 8-sublane rule), else 256
    # (a multiple of 8/16/32, so valid for f32/bf16/int8 packing).
    tm = M if M <= row_cap else row_cap
    row_tiles = _cdiv(M, tm)
    ts_budget = max(128, tile_budget_bytes // max(1, tm * itemsize))

    cost = pl.CostEstimate(flops=M * S, transcendentals=0,
                           bytes_accessed=M * S * itemsize + M * 4)
    vmem_limit = 32 * 1024 * 1024  # safe on v5e, within default on v6e/v7x

    if S <= ts_budget:
        # ---- Path A: one block spans the whole reduction axis. ----
        out = pl.pallas_call(
            functools.partial(_mean_rows_kernel, inv_s=inv_s),
            out_shape=jax.ShapeDtypeStruct((M, 1), jnp.float32),
            grid=(row_tiles,),
            in_specs=[pl.BlockSpec((tm, S), lambda i: (i, 0))],
            out_specs=pl.BlockSpec((tm, 1), lambda i: (i, 0)),
            compiler_params=pltpu.CompilerParams(
                dimension_semantics=("parallel",), vmem_limit_bytes=vmem_limit),
            cost_estimate=cost,
        )(x2)
        res = out[:, 0]
    else:
        # ---- Path B: tiled reduction with VMEM-resident accumulator. ----
        ts = (ts_budget // 128) * 128
        n_s = _cdiv(S, ts)
        # Keep both v7x TensorCores busy when there is only one row tile: split the
        # reduction range into 2 partial sums (combined below). No-op on v5e/v6e.
        n_splits = 2 if (row_tiles == 1 and n_s >= 2) else 1
        n_per_split = _cdiv(n_s, n_splits)
        need_mask = (S % ts != 0) or (n_splits * n_per_split != n_s)

        def x_map(c, i, j):
            g = c * n_per_split + j
            # Clamp so no DMA starts fully out of bounds; the duplicate block is masked to 0.
            return (i, jnp.minimum(g, n_s - 1))

        out = pl.pallas_call(
            functools.partial(_mean_acc_kernel, inv_s=inv_s, ts=ts, s_total=S,
                              n_per_split=n_per_split, need_mask=need_mask),
            out_shape=jax.ShapeDtypeStruct((n_splits, M, 1), jnp.float32),
            grid=(n_splits, row_tiles, n_per_split),
            in_specs=[pl.BlockSpec((tm, ts), x_map)],
            out_specs=pl.BlockSpec((None, tm, 1), lambda c, i, j: (c, i, 0)),
            scratch_shapes=[pltpu.VMEM((tm, 1), jnp.float32)],
            compiler_params=pltpu.CompilerParams(
                dimension_semantics=("parallel", "parallel", "arbitrary"),
                vmem_limit_bytes=vmem_limit),
            cost_estimate=cost,
        )(x2)
        res = jnp.sum(out[..., 0], axis=0)  # combine per-core partial sums (trivial (M,2) add)

    res = res.reshape(lead)
    if jnp.issubdtype(x.dtype, jnp.floating):
        res = res.astype(x.dtype)
    return res


if __name__ == "__main__":
    key = jax.random.PRNGKey(0)

    # Small shapes consistent with a Conv3d feature map feeding the global pool:
    # (batch=2, channels=4, depth=8, height=16, width=16).
    B, C, D, H, W = 2, 4, 8, 16, 16
    x = jax.random.normal(key, (B, C, D, H, W), jnp.float32)

    fwd = jax.jit(global_mean_pool_3d)
    out = jax.block_until_ready(fwd(x))
    assert out.shape == (B, C), out.shape
    ref = jnp.mean(x, axis=(-3, -2, -1))
    if not jnp.allclose(out, ref, rtol=1e-5, atol=1e-5):
        raise AssertionError(
            f"Path A mismatch: max abs err = {float(jnp.max(jnp.abs(out - ref)))}")

    # Exercise the tiled-reduction path (Path B) with a ragged, non-128-aligned S by
    # shrinking the tile budget; checks the in-kernel tail masking and the 2-way split.
    x2 = jax.random.normal(jax.random.PRNGKey(1), (2, 4, 5, 7, 9), jnp.float32)
    out2 = jax.block_until_ready(
        jax.jit(functools.partial(global_mean_pool_3d, tile_budget_bytes=4096))(x2))
    ref2 = jnp.mean(x2, axis=(-3, -2, -1))
    if not jnp.allclose(out2, ref2, rtol=1e-5, atol=1e-5):
        raise AssertionError(
            f"Path B mismatch: max abs err = {float(jnp.max(jnp.abs(out2 - ref2)))}")

    print("KERNEL_OK")
</pallas_src>

<mosaic_0001>
module attributes {stable_mosaic.version = 11 : i64} {
  func.func @_mean_rows_kernel(%arg0: i32, %arg1: memref<8x2048xf32, #tpu.memory_space<vmem>>, %arg2: memref<8x1xf32, #tpu.memory_space<vmem>>) attributes {dimension_semantics = [#tpu.dimension_semantics<parallel>], iteration_bounds = array<i64: 1>, scalar_prefetch = 0 : i64, scratch_operands = 0 : i64, tpu.core_type = #tpu.core_type<tc>, window_params = [{transform_indices = @transform_0, window_bounds = array<i64: 8, 2048>}, {transform_indices = @transform_1, window_bounds = array<i64: 8, 1>}]} {
    %c0 = arith.constant 0 : index
    %c0_0 = arith.constant 0 : index
    %0 = vector.load %arg1[%c0, %c0_0] : memref<8x2048xf32, #tpu.memory_space<vmem>>, vector<8x2048xf32>
    %cst = arith.constant dense<0.000000e+00> : vector<8xf32>
    %1 = vector.multi_reduction <add>, %0, %cst [1] : vector<8x2048xf32> to vector<8xf32>
    %2 = vector.shape_cast %1 : vector<8xf32> to vector<8x1xf32>
    %cst_1 = arith.constant 4.8828125E-4 : f32
    %3 = vector.broadcast %cst_1 : f32 to vector<8x1xf32>
    %4 = arith.mulf %2, %3 : vector<8x1xf32>
    %c0_2 = arith.constant 0 : index
    %c0_3 = arith.constant 0 : index
    %5 = vector.load %arg2[%c0_2, %c0_3] : memref<8x1xf32, #tpu.memory_space<vmem>>, vector<8x1xf32>
    tpu.vector_store %arg2[%c0_2, %c0_3], %4 {strides = array<i32>} : memref<8x1xf32, #tpu.memory_space<vmem>>, vector<8x1xf32>,
    return
  }
  func.func @transform_0(%arg0: i32) -> (i32, i32) {
    %c0_i32 = arith.constant 0 : i32
    %c0_i32_0 = arith.constant 0 : i32
    return %arg0, %c0_i32 : i32, i32
  }
  func.func @transform_1(%arg0: i32) -> (i32, i32) {
    %c0_i32 = arith.constant 0 : i32
    %c0_i32_0 = arith.constant 0 : i32
    return %arg0, %c0_i32 : i32, i32
  }
}

</mosaic_0001>

<bundles_post_ra>
// kernel: squeeze.1
= control target key start
LH: loop header
LB: loop body
LE: loop exit
PB: predicated region body
PF: predicated region fallthrough
CT: control target
= control target key end

     0   :  { %s77_s0 = inlined_call_operand.vmem [shape: f32[8], index: 0, kind: input, shape index: {}]   ;;  %s78_s1 = inlined_call_operand.hbm [shape: f32[2,4], index: 1, kind: output, shape index: {}]  }
   0x1   :  { %v6_v0 = vld [vmem:[%s77_s0] sm:$0x1] }
   0x2   :  { %2 = vsyncpa [#allocation1], 0  ;;  %7 = vst [vmem:[#allocation3] sm:$0x1] %v6_v0  ;;  %vm9_vm0 = vcmask 31744   ;;  %s59_s0 = smov 124  }
   0x3   :  { %s60_s8 = smov [#allocation0]  }
   0x4   :  { %s29_s9 = sshll.u32 %s60_s8, 4  ;;  %s30_s9 = int_to_ptr.vmem [resolvable:$true] %s29_s9 }
   0x5   :  { %s37_s10 = scalar_lea.vmem %s30_s9, 32  ;;  %p42_p1 = scmp.lt.s32.totalorder %s30_s9, %s30_s9 }
   0x6   :  { %p38_p0 = scmp.ne.s32.totalorder %s30_s9, %s37_s10  ;;  %p43_p2 = scmp.lt.s32.totalorder %s37_s10, %s37_s10 }
   0x8   :  { %p44_p3 = por %p43_p2, %p42_p1 }
   0x9   :  { %v11_v1 = vld [vmem:[#allocation3] sm:$0x1]  }
   0xa   :  { %v8_v2 = vld [vmem:[#allocation3] sm:$0x1]   ;;  %12 = vrot.lane.b32.xlu0 %v11_v1, %s59_s0  ;;  %p45_p4 = pnand %p44_p3, %p38_p0 }
   0xb   :  { %10 = vst.msk [vmem:[#allocation2] sm:$0x1] %vm9_vm0, %v8_v2  }
  0x7c   :  { %v13_v3 = vpop.permute.xlu0 %12  }
  0x7d   :  { %16 = vst.msk [vmem:[#allocation2 + $0x1] sm:$0x1] %vm9_vm0, %v13_v3  }
  0x84   :  { %v21_v4 = vld [vmem:[#allocation2] sm:$0x3] }
  0x85   :  { %24 = vst [vmem:[#allocation0] sm:$0x3] %v21_v4 }
  0x86   :  { %48 = shalt.err (!%p45_p4)
}
  0x87   :  { %32 = dma.vmem_to_hbm [thread:$0]  %s30_s9, 32, %s78_s1, [#allocation1]  }
  0x88   :  { %57 = dma.done.wait [#allocation1], 32  }
  0x89   :  { %58 = vsyncadd [#allocation1], 4294967264 }
  0x8a   :  { %34 = vsyncpa [#allocation1], 1 }

// kernel: global_mean_pool_3d.1
= control target key start
LH: loop header
LB: loop body
LE: loop exit
PB: predicated region body
PF: predicated region fallthrough
CT: control target
= control target key end

     0   :  { %vm42_vm0 = vcmask 7168   ;;  %s109_s0 = inlined_call_operand.vmem [shape: f32[8,2048], index: 0, kind: input, shape index: {}]   ;;  %s110_s1 = inlined_call_operand.vmem [shape: f32[8,1], index: 1, kind: output, shape index: {}]  }
   0x1   :  { %v8_v0 = vld [vmem:[%s109_s0] sm:$0xff]  ;;  %v9_v1 = vld [vmem:[%s109_s0 + $0x8] sm:$0xff]  ;;  %v10_v2 = vld [vmem:[%s109_s0 + $0x10] sm:$0xff] }
   0x2   :  { %v24_v3 = vadd.f32 %v9_v1, %v8_v0  ;;  %v11_v4 = vld [vmem:[%s109_s0 + $0x18] sm:$0xff]  ;;  %v12_v6 = vld [vmem:[%s109_s0 + $0x20] sm:$0xff]  ;;  %v13_v8 = vld [vmem:[%s109_s0 + $0x28] sm:$0xff] }
   0x3   :  { %v14_v10 = vld [vmem:[%s109_s0 + $0x30] sm:$0xff]  ;;  %v15_v12 = vld [vmem:[%s109_s0 + $0x38] sm:$0xff]  ;;  %v16_v14 = vld [vmem:[%s109_s0 + $0x40] sm:$0xff] }
   0x4   :  { %v25_v5 = vadd.f32 %v24_v3, %v10_v2  ;;  %v17_v16 = vld [vmem:[%s109_s0 + $0x48] sm:$0xff]  ;;  %v18_v18 = vld [vmem:[%s109_s0 + $0x50] sm:$0xff]  ;;  %v19_v20 = vld [vmem:[%s109_s0 + $0x58] sm:$0xff] }
   0x5   :  { %v20_v22 = vld [vmem:[%s109_s0 + $0x60] sm:$0xff]  ;;  %v21_v24 = vld [vmem:[%s109_s0 + $0x68] sm:$0xff]  ;;  %v22_v26 = vld [vmem:[%s109_s0 + $0x70] sm:$0xff] }
   0x6   :  { %v26_v7 = vadd.f32 %v25_v5, %v11_v4  ;;  %v23_v28 = vld [vmem:[%s109_s0 + $0x78] sm:$0xff] }
   0x8   :  { %v27_v9 = vadd.f32 %v26_v7, %v12_v6 }
   0xa   :  { %v28_v11 = vadd.f32 %v27_v9, %v13_v8 }
   0xc   :  { %v29_v13 = vadd.f32 %v28_v11, %v14_v10 }
   0xe   :  { %v30_v15 = vadd.f32 %v29_v13, %v15_v12 }
  0x10   :  { %v31_v17 = vadd.f32 %v30_v15, %v16_v14 }
  0x12   :  { %v32_v19 = vadd.f32 %v31_v17, %v17_v16 }
  0x14   :  { %v33_v21 = vadd.f32 %v32_v19, %v18_v18 }
  0x16   :  { %v34_v23 = vadd.f32 %v33_v21, %v19_v20 }
  0x18   :  { %v35_v25 = vadd.f32 %v34_v23, %v20_v22 }
  0x1a   :  { %v36_v27 = vadd.f32 %v35_v25, %v21_v24 }
  0x1c   :  { %v37_v29 = vadd.f32 %v36_v27, %v22_v26 }
  0x1e   :  { %v38_v30 = vadd.f32 %v37_v29, %v23_v28 }
  0x20   :  { %39 = vadd.xlane.f32.xlu0 %v38_v30 }
  0xa9   :  { %v40_v31 = vpop.xlane.xlu0 %39 }
  0xaa   :  { %v41_v32 = vmul.f32 0.00048828125, %v40_v31 }
  0xac   :  { %43 = vst.msk [vmem:[%s110_s1] sm:$0xff] %vm42_vm0, %v41_v32 }

</bundles_post_ra>
